<compile_context>
chip_gen: v6e
topology: v6e:2x2x1
jax: 0.10.0
libtpu: 0.0.40
codegen_flags: <defaults>
</compile_context>

<pallas_src>
import jax
import jax.numpy as jnp
from jax.experimental import pallas as pl
from jax.experimental.pallas import tpu as pltpu

K = 3                 # Khop
NEG_SLOPE = 0.01      # nn.LeakyReLU default
OUT_PAD = 128         # lane-dense output width; real outputs live in [:, :4]


def _leaky(x):
    return jnp.where(x >= 0, x, NEG_SLOPE * x)


# ------------------------------ Pallas kernel ------------------------------

def gnn_kernel(x_ref, a_ref, p_ref,
               w1_ref, b1_ref, w2_ref, b2_ref,
               hw1_ref, hb1_ref, hw2_ref, hb2_ref, hw3_ref, hb3_ref,
               out_ref):
    a = a_ref[...]          # (N, N)   bf16  normalized adjacency (A[dst, src])
    x = x_ref[...]          # (N, Cin) bf16

    def tagconv(h0, w_flat_ref, b_ref):
        # h0: (N, C) bf16.  Build hop-concat [h, A h, ..., A^K h] on the lane axis,
        # then apply ALL hop weights with a single MXU matmul.
        hops = [h0]
        h = h0
        for _ in range(K):
            h = jnp.dot(a, h, preferred_element_type=jnp.float32).astype(jnp.bfloat16)
            hops.append(h)
        hs = jnp.concatenate(hops, axis=-1)                      # (N, (K+1)*C) bf16
        out = jnp.dot(hs, w_flat_ref[...],
                      preferred_element_type=jnp.float32)        # one fused matmul
        return out + b_ref[...]                                  # f32 bias add

    h1 = _leaky(tagconv(x, w1_ref, b1_ref)).astype(jnp.bfloat16)    # (N, GCN)
    h2 = _leaky(tagconv(h1, w2_ref, b2_ref)).astype(jnp.bfloat16)   # (N, GCN)

    # global mean pool as a (G, N) matmul
    pooled = jnp.dot(p_ref[...], h2, preferred_element_type=jnp.float32)   # (G, GCN) f32

    # merged block-diagonal Phi/Theta head: 3 matmuls, result is already [phi | theta] (+ lane pad)
    z = _leaky(jnp.dot(pooled.astype(jnp.bfloat16), hw1_ref[...],
                       preferred_element_type=jnp.float32) + hb1_ref[...])
    z = _leaky(jnp.dot(z.astype(jnp.bfloat16), hw2_ref[...],
                       preferred_element_type=jnp.float32) + hb2_ref[...])
    out_ref[...] = jnp.dot(z.astype(jnp.bfloat16), hw3_ref[...],
                           preferred_element_type=jnp.float32) + hb3_ref[...]


# ------------------------------ wrapper / param packing ------------------------------

def _block_diag(a, b):
    m, n = a.shape
    p, q = b.shape
    top = jnp.concatenate([a, jnp.zeros((m, q), a.dtype)], axis=1)
    bot = jnp.concatenate([jnp.zeros((p, n), b.dtype), b], axis=1)
    return jnp.concatenate([top, bot], axis=0)


def pack_params(params):
    """One-time host-side fusion of the hop weights and the two dense heads."""
    kp1, cin, gcn = params["w1"].shape
    assert kp1 == K + 1
    w1_flat = params["w1"].reshape(kp1 * cin, gcn).astype(jnp.bfloat16)          # ((K+1)*Cin, GCN)
    w2_flat = params["w2"].reshape((K + 1) * gcn, gcn).astype(jnp.bfloat16)      # ((K+1)*GCN, GCN)

    hw1 = jnp.concatenate([params["pw1"], params["tw1"]], axis=1)                # (GCN, 2*D)
    hb1 = jnp.concatenate([params["pb1"], params["tb1"]], axis=1)                # (1, 2*D)
    hw2 = _block_diag(params["pw2"], params["tw2"])                              # (2*D, 2*D)
    hb2 = jnp.concatenate([params["pb2"], params["tb2"]], axis=1)                # (1, 2*D)
    hw3 = _block_diag(params["pw3"], params["tw3"])                              # (2*D, 4)
    hb3 = jnp.concatenate([params["pb3"], params["tb3"]], axis=1)                # (1, 4)

    # lane-pad the final head so the kernel's output store is lane-dense (G, 128)
    hw3 = jnp.concatenate(
        [hw3, jnp.zeros((hw3.shape[0], OUT_PAD - hw3.shape[1]), hw3.dtype)], axis=1)
    hb3 = jnp.concatenate(
        [hb3, jnp.zeros((1, OUT_PAD - hb3.shape[1]), hb3.dtype)], axis=1)

    return dict(
        w1=w1_flat, b1=params["b1"].astype(jnp.float32),
        w2=w2_flat, b2=params["b2"].astype(jnp.float32),
        hw1=hw1.astype(jnp.bfloat16), hb1=hb1.astype(jnp.float32),
        hw2=hw2.astype(jnp.bfloat16), hb2=hb2.astype(jnp.float32),
        hw3=hw3.astype(jnp.bfloat16), hb3=hb3.astype(jnp.float32),
    )


def model_1_1_forward(x, adj_norm, pool, packed):
    n_graphs = pool.shape[0]
    inputs = (x.astype(jnp.bfloat16),
              adj_norm.astype(jnp.bfloat16),
              pool.astype(jnp.bfloat16),
              packed["w1"], packed["b1"], packed["w2"], packed["b2"],
              packed["hw1"], packed["hb1"], packed["hw2"], packed["hb2"],
              packed["hw3"], packed["hb3"])
    vmem = pl.BlockSpec(memory_space=pltpu.MemorySpace.VMEM)
    out = pl.pallas_call(
        gnn_kernel,
        out_shape=jax.ShapeDtypeStruct((n_graphs, OUT_PAD), jnp.float32),
        in_specs=[vmem] * len(inputs),
        out_specs=vmem,
        compiler_params=pltpu.CompilerParams(vmem_limit_bytes=48 * 1024 * 1024),
    )(*inputs)
    return out[:, :4]


# ---------------- glue: sparse graph -> dense operators ----------------

def build_norm_adj(edge_index, edge_weight, num_nodes):
    """add_self_loops + gcn_norm (symmetric, add_self_loops=False), dense A with A[dst, src]."""
    loop = jnp.arange(num_nodes, dtype=edge_index.dtype)
    ei = jnp.concatenate([edge_index, jnp.stack([loop, loop])], axis=1)
    ew = jnp.concatenate([edge_weight, jnp.ones((num_nodes,), edge_weight.dtype)])
    row, col = ei[0], ei[1]                                  # src, dst
    deg = jnp.zeros((num_nodes,), ew.dtype).at[col].add(ew)
    dinv = jnp.where(deg > 0, jax.lax.rsqrt(deg), 0.0)
    norm = dinv[row] * ew * dinv[col]
    a = jnp.zeros((num_nodes, num_nodes), ew.dtype).at[col, row].add(norm)
    return a


def build_pool_matrix(batching, num_graphs):
    onehot = (batching[None, :] == jnp.arange(num_graphs)[:, None]).astype(jnp.float32)
    counts = jnp.maximum(onehot.sum(axis=1, keepdims=True), 1.0)
    return onehot / counts


# ---------------- pure-JAX reference (unfused math, same bf16 operand casts) ----------------

def reference_forward(x, adj, pool, params):
    a = adj.astype(jnp.bfloat16)
    p = pool.astype(jnp.bfloat16)

    def tagconv(h0, w, b):
        w = w.astype(jnp.bfloat16)
        out = jnp.dot(h0, w[0], preferred_element_type=jnp.float32)
        h = h0
        for k in range(1, K + 1):
            h = jnp.dot(a, h, preferred_element_type=jnp.float32).astype(jnp.bfloat16)
            out = out + jnp.dot(h, w[k], preferred_element_type=jnp.float32)
        return out + b

    h1 = _leaky(tagconv(x.astype(jnp.bfloat16), params["w1"], params["b1"])).astype(jnp.bfloat16)
    h2 = _leaky(tagconv(h1, params["w2"], params["b2"])).astype(jnp.bfloat16)
    pooled = jnp.dot(p, h2, preferred_element_type=jnp.float32)

    def head(w1, b1, w2, b2, w3, b3):
        z = _leaky(jnp.dot(pooled.astype(jnp.bfloat16), w1.astype(jnp.bfloat16),
                           preferred_element_type=jnp.float32) + b1)
        z = _leaky(jnp.dot(z.astype(jnp.bfloat16), w2.astype(jnp.bfloat16),
                           preferred_element_type=jnp.float32) + b2)
        return jnp.dot(z.astype(jnp.bfloat16), w3.astype(jnp.bfloat16),
                       preferred_element_type=jnp.float32) + b3

    phi = head(params["pw1"], params["pb1"], params["pw2"], params["pb2"],
               params["pw3"], params["pb3"])
    theta = head(params["tw1"], params["tb1"], params["tw2"], params["tb2"],
                 params["tw3"], params["tb3"])
    return jnp.concatenate([phi, theta], axis=1)


if __name__ == "__main__":
    in_channels, gcn_nodes, dense_nodes = 3, 16, 16
    nodes_per_graph, num_graphs = 8, 2
    num_nodes = nodes_per_graph * num_graphs

    key = jax.random.PRNGKey(0)
    keys = jax.random.split(key, 20)

    def init(k, shape, scale=0.1):
        return scale * jax.random.normal(k, shape, dtype=jnp.float32)

    params = {
        "w1": init(keys[0], (K + 1, in_channels, gcn_nodes)),
        "b1": init(keys[1], (1, gcn_nodes)),
        "w2": init(keys[2], (K + 1, gcn_nodes, gcn_nodes)),
        "b2": init(keys[3], (1, gcn_nodes)),
        "pw1": init(keys[4], (gcn_nodes, dense_nodes)),
        "pb1": init(keys[5], (1, dense_nodes)),
        "pw2": init(keys[6], (dense_nodes, dense_nodes)),
        "pb2": init(keys[7], (1, dense_nodes)),
        "pw3": init(keys[8], (dense_nodes, 2)),
        "pb3": init(keys[9], (1, 2)),
        "tw1": init(keys[10], (gcn_nodes, dense_nodes)),
        "tb1": init(keys[11], (1, dense_nodes)),
        "tw2": init(keys[12], (dense_nodes, dense_nodes)),
        "tb2": init(keys[13], (1, dense_nodes)),
        "tw3": init(keys[14], (dense_nodes, 2)),
        "tb3": init(keys[15], (1, 2)),
    }

    # node features
    x = jax.random.normal(keys[16], (num_nodes, in_channels), dtype=jnp.float32)

    # small batched graph: bidirectional ring within each graph
    src_list, dst_list = [], []
    for g in range(num_graphs):
        base = g * nodes_per_graph
        for i in range(nodes_per_graph):
            a_n, b_n = base + i, base + (i + 1) % nodes_per_graph
            src_list += [a_n, b_n]
            dst_list += [b_n, a_n]
    edge_index = jnp.array([src_list, dst_list], dtype=jnp.int32)
    edge_weight = jax.random.uniform(keys[17], (edge_index.shape[1],),
                                     dtype=jnp.float32, minval=0.5, maxval=1.5)
    batching = jnp.repeat(jnp.arange(num_graphs, dtype=jnp.int32), nodes_per_graph)

    adj_norm = build_norm_adj(edge_index, edge_weight, num_nodes)
    pool = build_pool_matrix(batching, num_graphs)
    packed = pack_params(params)

    out = model_1_1_forward(x, adj_norm, pool, packed)
    out = jax.block_until_ready(out)

    ref = reference_forward(x, adj_norm, pool, params)
    assert out.shape == (num_graphs, 4)
    assert jnp.allclose(out, ref, atol=1e-3, rtol=1e-2), (out, ref)

    print("KERNEL_OK")
</pallas_src>

<mosaic_0001>
module attributes {stable_mosaic.version = 11 : i64} {
  func.func @gnn_kernel(%arg0: memref<16x3xbf16, #tpu.memory_space<vmem>>, %arg1: memref<16x16xbf16, #tpu.memory_space<vmem>>, %arg2: memref<2x16xbf16, #tpu.memory_space<vmem>>, %arg3: memref<12x16xbf16, #tpu.memory_space<vmem>>, %arg4: memref<1x16xf32, #tpu.memory_space<vmem>>, %arg5: memref<64x16xbf16, #tpu.memory_space<vmem>>, %arg6: memref<1x16xf32, #tpu.memory_space<vmem>>, %arg7: memref<16x32xbf16, #tpu.memory_space<vmem>>, %arg8: memref<1x32xf32, #tpu.memory_space<vmem>>, %arg9: memref<32x32xbf16, #tpu.memory_space<vmem>>, %arg10: memref<1x32xf32, #tpu.memory_space<vmem>>, %arg11: memref<32x128xbf16, #tpu.memory_space<vmem>>, %arg12: memref<1x128xf32, #tpu.memory_space<vmem>>, %arg13: memref<2x128xf32, #tpu.memory_space<vmem>>) attributes {dimension_semantics = [], scalar_prefetch = 0 : i64, scratch_operands = 0 : i64, tpu.core_type = #tpu.core_type<tc>} {
    %c0 = arith.constant 0 : index
    %c0_0 = arith.constant 0 : index
    %0 = vector.load %arg1[%c0, %c0_0] : memref<16x16xbf16, #tpu.memory_space<vmem>>, vector<16x16xbf16>
    %c0_1 = arith.constant 0 : index
    %c0_2 = arith.constant 0 : index
    %1 = vector.load %arg0[%c0_1, %c0_2] : memref<16x3xbf16, #tpu.memory_space<vmem>>, vector<16x3xbf16>
    %cst = arith.constant dense<0.000000e+00> : vector<16x3xf32>
    %2 = tpu.matmul %0, %1, %cst {dimension_numbers = #tpu.dot_dimension_numbers<[1], [0], [0], [1], [0, 0, 1, 1], [], []>} : vector<16x16xbf16>, vector<16x3xbf16>, vector<16x3xf32> -> vector<16x3xf32>
    %3 = arith.truncf %2 : vector<16x3xf32> to vector<16x3xbf16>
    %cst_3 = arith.constant dense<0.000000e+00> : vector<16x3xf32>
    %4 = tpu.matmul %0, %3, %cst_3 {dimension_numbers = #tpu.dot_dimension_numbers<[1], [0], [0], [1], [0, 0, 1, 1], [], []>} : vector<16x16xbf16>, vector<16x3xbf16>, vector<16x3xf32> -> vector<16x3xf32>
    %5 = arith.truncf %4 : vector<16x3xf32> to vector<16x3xbf16>
    %cst_4 = arith.constant dense<0.000000e+00> : vector<16x3xf32>
    %6 = tpu.matmul %0, %5, %cst_4 {dimension_numbers = #tpu.dot_dimension_numbers<[1], [0], [0], [1], [0, 0, 1, 1], [], []>} : vector<16x16xbf16>, vector<16x3xbf16>, vector<16x3xf32> -> vector<16x3xf32>
    %7 = arith.truncf %6 : vector<16x3xf32> to vector<16x3xbf16>
    %8 = tpu.concatenate %1, %3, %5, %7 in 1 : vector<16x3xbf16>, vector<16x3xbf16>, vector<16x3xbf16>, vector<16x3xbf16> -> vector<16x12xbf16>
    %c0_5 = arith.constant 0 : index
    %c0_6 = arith.constant 0 : index
    %9 = vector.load %arg3[%c0_5, %c0_6] : memref<12x16xbf16, #tpu.memory_space<vmem>>, vector<12x16xbf16>
    %cst_7 = arith.constant dense<0.000000e+00> : vector<16x16xf32>
    %10 = tpu.matmul %8, %9, %cst_7 {dimension_numbers = #tpu.dot_dimension_numbers<[1], [0], [0], [1], [0, 0, 1, 1], [], []>} : vector<16x12xbf16>, vector<12x16xbf16>, vector<16x16xf32> -> vector<16x16xf32>
    %c0_8 = arith.constant 0 : index
    %c0_9 = arith.constant 0 : index
    %11 = vector.load %arg4[%c0_8, %c0_9] : memref<1x16xf32, #tpu.memory_space<vmem>>, vector<1x16xf32>
    %12 = vector.broadcast %11 : vector<1x16xf32> to vector<16x16xf32>
    %13 = arith.addf %10, %12 : vector<16x16xf32>
    %cst_10 = arith.constant 0.000000e+00 : f32
    %14 = vector.broadcast %cst_10 : f32 to vector<16x16xf32>
    %15 = arith.cmpf oge, %13, %14 : vector<16x16xf32>
    %cst_11 = arith.constant 0.00999999977 : f32
    %16 = vector.broadcast %cst_11 : f32 to vector<16x16xf32>
    %17 = arith.mulf %16, %13 : vector<16x16xf32>
    %18 = arith.select %15, %13, %17 : vector<16x16xi1>, vector<16x16xf32>
    %19 = arith.truncf %18 : vector<16x16xf32> to vector<16x16xbf16>
    %cst_12 = arith.constant dense<0.000000e+00> : vector<16x16xf32>
    %20 = tpu.matmul %0, %19, %cst_12 {dimension_numbers = #tpu.dot_dimension_numbers<[1], [0], [0], [1], [0, 0, 1, 1], [], []>} : vector<16x16xbf16>, vector<16x16xbf16>, vector<16x16xf32> -> vector<16x16xf32>
    %21 = arith.truncf %20 : vector<16x16xf32> to vector<16x16xbf16>
    %cst_13 = arith.constant dense<0.000000e+00> : vector<16x16xf32>
    %22 = tpu.matmul %0, %21, %cst_13 {dimension_numbers = #tpu.dot_dimension_numbers<[1], [0], [0], [1], [0, 0, 1, 1], [], []>} : vector<16x16xbf16>, vector<16x16xbf16>, vector<16x16xf32> -> vector<16x16xf32>
    %23 = arith.truncf %22 : vector<16x16xf32> to vector<16x16xbf16>
    %cst_14 = arith.constant dense<0.000000e+00> : vector<16x16xf32>
    %24 = tpu.matmul %0, %23, %cst_14 {dimension_numbers = #tpu.dot_dimension_numbers<[1], [0], [0], [1], [0, 0, 1, 1], [], []>} : vector<16x16xbf16>, vector<16x16xbf16>, vector<16x16xf32> -> vector<16x16xf32>
    %25 = arith.truncf %24 : vector<16x16xf32> to vector<16x16xbf16>
    %26 = tpu.concatenate %19, %21, %23, %25 in 1 : vector<16x16xbf16>, vector<16x16xbf16>, vector<16x16xbf16>, vector<16x16xbf16> -> vector<16x64xbf16>
    %c0_15 = arith.constant 0 : index
    %c0_16 = arith.constant 0 : index
    %27 = vector.load %arg5[%c0_15, %c0_16] : memref<64x16xbf16, #tpu.memory_space<vmem>>, vector<64x16xbf16>
    %cst_17 = arith.constant dense<0.000000e+00> : vector<16x16xf32>
    %28 = tpu.matmul %26, %27, %cst_17 {dimension_numbers = #tpu.dot_dimension_numbers<[1], [0], [0], [1], [0, 0, 1, 1], [], []>} : vector<16x64xbf16>, vector<64x16xbf16>, vector<16x16xf32> -> vector<16x16xf32>
    %c0_18 = arith.constant 0 : index
    %c0_19 = arith.constant 0 : index
    %29 = vector.load %arg6[%c0_18, %c0_19] : memref<1x16xf32, #tpu.memory_space<vmem>>, vector<1x16xf32>
    %30 = vector.broadcast %29 : vector<1x16xf32> to vector<16x16xf32>
    %31 = arith.addf %28, %30 : vector<16x16xf32>
    %cst_20 = arith.constant 0.000000e+00 : f32
    %32 = vector.broadcast %cst_20 : f32 to vector<16x16xf32>
    %33 = arith.cmpf oge, %31, %32 : vector<16x16xf32>
    %cst_21 = arith.constant 0.00999999977 : f32
    %34 = vector.broadcast %cst_21 : f32 to vector<16x16xf32>
    %35 = arith.mulf %34, %31 : vector<16x16xf32>
    %36 = arith.select %33, %31, %35 : vector<16x16xi1>, vector<16x16xf32>
    %37 = arith.truncf %36 : vector<16x16xf32> to vector<16x16xbf16>
    %c0_22 = arith.constant 0 : index
    %c0_23 = arith.constant 0 : index
    %38 = vector.load %arg2[%c0_22, %c0_23] : memref<2x16xbf16, #tpu.memory_space<vmem>>, vector<2x16xbf16>
    %cst_24 = arith.constant dense<0.000000e+00> : vector<2x16xf32>
    %39 = tpu.matmul %38, %37, %cst_24 {dimension_numbers = #tpu.dot_dimension_numbers<[1], [0], [0], [1], [0, 0, 1, 1], [], []>} : vector<2x16xbf16>, vector<16x16xbf16>, vector<2x16xf32> -> vector<2x16xf32>
    %40 = arith.truncf %39 : vector<2x16xf32> to vector<2x16xbf16>
    %c0_25 = arith.constant 0 : index
    %c0_26 = arith.constant 0 : index
    %41 = vector.load %arg7[%c0_25, %c0_26] : memref<16x32xbf16, #tpu.memory_space<vmem>>, vector<16x32xbf16>
    %cst_27 = arith.constant dense<0.000000e+00> : vector<2x32xf32>
    %42 = tpu.matmul %40, %41, %cst_27 {dimension_numbers = #tpu.dot_dimension_numbers<[1], [0], [0], [1], [0, 0, 1, 1], [], []>} : vector<2x16xbf16>, vector<16x32xbf16>, vector<2x32xf32> -> vector<2x32xf32>
    %c0_28 = arith.constant 0 : index
    %c0_29 = arith.constant 0 : index
    %43 = vector.load %arg8[%c0_28, %c0_29] : memref<1x32xf32, #tpu.memory_space<vmem>>, vector<1x32xf32>
    %44 = vector.broadcast %43 : vector<1x32xf32> to vector<2x32xf32>
    %45 = arith.addf %42, %44 : vector<2x32xf32>
    %cst_30 = arith.constant 0.000000e+00 : f32
    %46 = vector.broadcast %cst_30 : f32 to vector<2x32xf32>
    %47 = arith.cmpf oge, %45, %46 : vector<2x32xf32>
    %cst_31 = arith.constant 0.00999999977 : f32
    %48 = vector.broadcast %cst_31 : f32 to vector<2x32xf32>
    %49 = arith.mulf %48, %45 : vector<2x32xf32>
    %50 = arith.select %47, %45, %49 : vector<2x32xi1>, vector<2x32xf32>
    %51 = arith.truncf %50 : vector<2x32xf32> to vector<2x32xbf16>
    %c0_32 = arith.constant 0 : index
    %c0_33 = arith.constant 0 : index
    %52 = vector.load %arg9[%c0_32, %c0_33] : memref<32x32xbf16, #tpu.memory_space<vmem>>, vector<32x32xbf16>
    %cst_34 = arith.constant dense<0.000000e+00> : vector<2x32xf32>
    %53 = tpu.matmul %51, %52, %cst_34 {dimension_numbers = #tpu.dot_dimension_numbers<[1], [0], [0], [1], [0, 0, 1, 1], [], []>} : vector<2x32xbf16>, vector<32x32xbf16>, vector<2x32xf32> -> vector<2x32xf32>
    %c0_35 = arith.constant 0 : index
    %c0_36 = arith.constant 0 : index
    %54 = vector.load %arg10[%c0_35, %c0_36] : memref<1x32xf32, #tpu.memory_space<vmem>>, vector<1x32xf32>
    %55 = vector.broadcast %54 : vector<1x32xf32> to vector<2x32xf32>
    %56 = arith.addf %53, %55 : vector<2x32xf32>
    %cst_37 = arith.constant 0.000000e+00 : f32
    %57 = vector.broadcast %cst_37 : f32 to vector<2x32xf32>
    %58 = arith.cmpf oge, %56, %57 : vector<2x32xf32>
    %cst_38 = arith.constant 0.00999999977 : f32
    %59 = vector.broadcast %cst_38 : f32 to vector<2x32xf32>
    %60 = arith.mulf %59, %56 : vector<2x32xf32>
    %61 = arith.select %58, %56, %60 : vector<2x32xi1>, vector<2x32xf32>
    %62 = arith.truncf %61 : vector<2x32xf32> to vector<2x32xbf16>
    %c0_39 = arith.constant 0 : index
    %c0_40 = arith.constant 0 : index
    %63 = vector.load %arg11[%c0_39, %c0_40] : memref<32x128xbf16, #tpu.memory_space<vmem>>, vector<32x128xbf16>
    %cst_41 = arith.constant dense<0.000000e+00> : vector<2x128xf32>
    %64 = tpu.matmul %62, %63, %cst_41 {dimension_numbers = #tpu.dot_dimension_numbers<[1], [0], [0], [1], [0, 0, 1, 1], [], []>} : vector<2x32xbf16>, vector<32x128xbf16>, vector<2x128xf32> -> vector<2x128xf32>
    %c0_42 = arith.constant 0 : index
    %c0_43 = arith.constant 0 : index
    %65 = vector.load %arg12[%c0_42, %c0_43] : memref<1x128xf32, #tpu.memory_space<vmem>>, vector<1x128xf32>
    %66 = vector.broadcast %65 : vector<1x128xf32> to vector<2x128xf32>
    %67 = arith.addf %64, %66 : vector<2x128xf32>
    %c0_44 = arith.constant 0 : index
    %c0_45 = arith.constant 0 : index
    %68 = vector.load %arg13[%c0_44, %c0_45] : memref<2x128xf32, #tpu.memory_space<vmem>>, vector<2x128xf32>
    tpu.vector_store %arg13[%c0_44, %c0_45], %67 {strides = array<i32>} : memref<2x128xf32, #tpu.memory_space<vmem>>, vector<2x128xf32>,
    return
  }
}

</mosaic_0001>

<bundles_post_ra>
// kernel: tpu_custom_call.1
= control target key start
LH: loop header
LB: loop body
LE: loop exit
PB: predicated region body
PF: predicated region fallthrough
CT: control target
= control target key end

     0   :  { %18 = vsyncpa [#allocation3], 0  ;;  %s1188_s0 = inlined_call_operand.vmem [shape: bf16[16,3], index: 0, kind: input, shape index: {}]   ;;  %s1189_s1 = inlined_call_operand.vmem [shape: bf16[16,16], index: 1, kind: input, shape index: {}]   ;;  %s1190_s2 = inlined_call_operand.vmem [shape: bf16[2,16], index: 2, kind: input, shape index: {}]   ;;  %s1191_s3 = inlined_call_operand.vmem [shape: bf16[12,16], index: 3, kind: input, shape index: {}]   ;;  %s1192_s4 = inlined_call_operand.hbm [shape: f32[1,16], index: 4, kind: input, shape index: {}]   ;;  %s1193_s5 = inlined_call_operand.vmem [shape: bf16[64,16], index: 5, kind: input, shape index: {}]   ;;  %s1194_s6 = inlined_call_operand.vmem [shape: f32[1,16], index: 6, kind: input, shape index: {}]   ;;  %s1195_s7 = inlined_call_operand.vmem [shape: bf16[16,32], index: 7, kind: input, shape index: {}]   ;;  %s1196_s8 = inlined_call_operand.vmem [shape: f32[1,32], index: 8, kind: input, shape index: {}]   ;;  %s1197_s9 = inlined_call_operand.vmem [shape: bf16[32,32], index: 9, kind: input, shape index: {}]   ;;  %s1198_s10 = inlined_call_operand.vmem [shape: f32[1,32], index: 10, kind: input, shape index: {}]   ;;  %s1199_s11 = inlined_call_operand.vmem [shape: bf16[32,128], index: 11, kind: input, shape index: {}]   ;;  %s1200_s12 = inlined_call_operand.vmem [shape: f32[1,128], index: 12, kind: input, shape index: {}]   ;;  %s1201_s13 = inlined_call_operand.hbm [shape: f32[2,128], index: 13, kind: output, shape index: {}]  }
   0x1   :  { %19 = vsyncpa [#allocation4], 0  ;;  %s990_s25 = smov [#allocation2]  }
   0x2   :  { %s34_s26 = sshll.u32 %s990_s25, 4  ;;  %s35_s26 = int_to_ptr.vmem [resolvable:$true] %s34_s26 }
   0x3   :  { %s954_s27 = scalar_lea.vmem %s35_s26, 16  ;;  %s958_s28 = scalar_lea.vmem %s35_s26, 32 }
   0x4   :  { %p955_p0 = scmp.ne.s32.totalorder %s35_s26, %s954_s27  ;;  %p959_p1 = scmp.lt.s32.totalorder %s35_s26, %s35_s26 }
   0x5   :  { %p960_p2 = scmp.lt.s32.totalorder %s958_s28, %s954_s27 }
   0x7   :  { %p961_p3 = por %p960_p2, %p959_p1 }
   0x9   :  { %p962_p4 = pnand %p961_p3, %p955_p0 }
   0xb   :  { %965 = shalt.err (!%p962_p4)
}
   0xc   :  { %37 = dma.hbm_to_vmem [thread:$0]  %s1192_s4, 16, %s35_s26, [#allocation3]  }
   0xd   :  { %986 = dma.done.wait [#allocation3], 16  }
   0xe   :  { %987 = vsyncadd [#allocation3], 4294967280  ;;  %v991_v0 = vmov 0.0   ;;  %vm992_vm0 = vmmov 0   ;;  %v934_v1 = vld [vmem:[%s1188_s0] sm:$0xff]   ;;  %vm73_vm1 = vcmask 130048  }
   0xf   :  { %842 = vmatprep.subr.bf16.mxu0 %v991_v0  ;;  %844 = vmatprep.mubr.msk.bf16.mxu0 %vm992_vm0, %v991_v0  ;;  %v1085_v2 = vld [vmem:[%s1189_s1] sm:$0xff]   ;;  %s993_s0 = smov 3   ;;  %s994_s1 = smov 6   ;;  %vm239_vm2 = vcmask 1045504   ;;  %vm212_vm3 = vcmask 23552   ;;  %vm216_vm4 = vcmask 48128  }
  0x10   :  { %848 = vmatprep.subr.bf16.mxu1 %v991_v0  ;;  %850 = vmatprep.mubr.msk.bf16.mxu1 %vm992_vm0, %v991_v0  ;;  %v936_v13 = vld [vmem:[%s1191_s3] sm:$0x3f]   ;;  %s995_s19 = smov 9   ;;  %vm219_vm5 = vcmask 72704   ;;  %vm236_vm6 = vcmask 97280   ;;  %s996_s3 = smov 16  }
  0x11   :  { %843 = vmatpush3.bf16.msra.mxu0 %v934_v1  ;;  %v241_v14 = vsel %vm239_vm2, %v936_v13, 0  ;;  %v789_v26 = vld [vmem:[#allocation2] ss:$0 sm:$0xff]  ;;  %s997_s20 = smov 32   ;;  %v937_v48 = vld [vmem:[%s1193_s5 + $0x18] sm:$0xff]   ;;  %v938_v49 = vld [vmem:[%s1193_s5 + $0x10] sm:$0xff]  }
  0x12   :  { %854 = vmatprep.subr.bf16.mxu0 %v991_v0  ;;  %v939_v50 = vld [vmem:[%s1193_s5 + $0x8] sm:$0xff]   ;;  %v940_v51 = vld [vmem:[%s1193_s5] sm:$0xff]   ;;  %s998_s29 = smov 48   ;;  %vm429_vm9 = vcmask 261120   ;;  %vm432_vm10 = vcmask 392192   ;;  %vm474_vm11 = vcmask 523264  }
  0x13   :  { %v795_v63 = vld [vmem:[%s1194_s6] ss:$0 sm:$0xff] }
  0x14   :  { %845 = vmatmul.mubr.msk.bf16.vlgmr.msra.gmra.mxu0 %vm73_vm1, %v1085_v2  ;;  %v941_v13 = vld [vmem:[%s1195_s7] sm:$0xff]  }
  0x15   :  { %856 = vmatprep.mubr.msk.bf16.mxu0 %vm992_vm0, %v991_v0 }
  0xd4   :  { %v111_v3 = vpop.f32.mrf.mxu0 }
  0xd6   :  { %v846_v4 = vpop.f32.mrf.mxu0 }
  0xd8   :  { %v114_v5 = vpop.f32.mrf.mxu0 }
  0xd9   :  { %v118_v6 = vpack.c.bf16 %v114_v5, %v111_v3 }
  0xda   :  { %v847_v7 = vpop.f32.mrf.mxu0 }
  0xdb   :  { %204 = vrot.lane.b32.xlu0 %v118_v6, %s993_s0  ;;  %849 = vmatpush3.bf16.msra.mxu1 %v118_v6 }
  0xdc   :  { %860 = vmatprep.subr.bf16.mxu1 %v991_v0 }
  0xde   :  { %851 = vmatmul.mubr.msk.bf16.vlgmr.msra.gmra.mxu1 %vm73_vm1, %v1085_v2 }
  0xdf   :  { %862 = vmatprep.mubr.msk.bf16.mxu1 %vm992_vm0, %v991_v0  ;;  %861 = vmatpush3.bf16.msra.mxu1 %v241_v14 }
  0xe0   :  { %872 = vmatprep.subr.bf16.mxu1 %v991_v0 }
 0x14d   :  { %v205_v20 = vpop.permute.xlu0 %204 }
 0x14e   :  { %v215_v22 = vsel %vm212_vm3, %v934_v1, %v205_v20  ;;  %v943_v20 = vld [vmem:[%s1197_s9] sm:$0xff]  }
 0x19e   :  { %v153_v8 = vpop.f32.mrf.mxu1 }
 0x1a0   :  { %v852_v9 = vpop.f32.mrf.mxu1 }
 0x1a2   :  { %v156_v10 = vpop.f32.mrf.mxu1 }
 0x1a3   :  { %v160_v11 = vpack.c.bf16 %v156_v10, %v153_v8 }
 0x1a4   :  { %v853_v12 = vpop.f32.mrf.mxu1 }
 0x1a5   :  { %207 = vrot.lane.b32.xlu0 %v160_v11, %s994_s1  ;;  %855 = vmatpush3.bf16.msra.mxu0 %v160_v11  ;;  %v525_v12 = vld [vmem:[%s1190_s2] sm:$0x1] }
 0x1a6   :  { %866 = vmatprep.subr.bf16.mxu0 %v991_v0 }
 0x1a8   :  { %857 = vmatmul.mubr.msk.bf16.vlgmr.msra.gmra.mxu0 %vm73_vm1, %v1085_v2 }
 0x1a9   :  { %868 = vmatprep.mubr.msk.bf16.mxu0 %vm992_vm0, %v991_v0 }
 0x217   :  { %v208_v21 = vpop.permute.xlu0 %207 }
 0x218   :  { %v218_v23 = vsel %vm216_vm4, %v215_v22, %v208_v21  ;;  %v802_v21 = vld [vmem:[%s1196_s8] ss:$0 sm:$0xff] }
 0x268   :  { %v195_v15 = vpop.f32.mrf.mxu0 }
 0x26a   :  { %v858_v16 = vpop.f32.mrf.mxu0 }
 0x26c   :  { %v198_v17 = vpop.f32.mrf.mxu0 }
 0x26d   :  { %v202_v18 = vpack.c.bf16 %v198_v17, %v195_v15 }
 0x26e   :  { %v859_v19 = vpop.f32.mrf.mxu0 }
 0x26f   :  { %210 = vrot.lane.b32.xlu1 %v202_v18, %s995_s19  ;;  %v942_v19 = vld [vmem:[%s1197_s9 + $0x8] sm:$0xff]  }
 0x2e1   :  { %v211_v24 = vpop.permute.xlu1 %210 }
 0x2e2   :  { %v221_v25 = vsel %vm219_vm5, %v218_v23, %v211_v24 }
 0x2e3   :  { %863 = vmatmul.mubr.msk.bf16.vlgmr.msra.gmra.mxu1 %vm236_vm6, %v221_v25 }
 0x2e4   :  { %874 = vmatprep.mubr.msk.bf16.mxu1 %vm992_vm0, %v991_v0 }
 0x3a3   :  { %v277_v27 = vpop.f32.mrf.mxu1 }
 0x3a4   :  { %v278_v28 = vadd.f32 %v789_v26, %v277_v27 }
 0x3a5   :  { %v864_v29 = vpop.f32.mrf.mxu1 }
 0x3a6   :  { %v286_v31 = vmul.f32 0.01, %v278_v28  ;;  %vm284_vm7 = vcmp.ge.f32.partialorder %v278_v28, 0.0 }
 0x3a7   :  { %v280_v30 = vpop.f32.mrf.mxu1 }
 0x3a8   :  { %v281_v32 = vadd.f32 %v789_v26, %v280_v30  ;;  %v288_v35 = vsel %vm284_vm7, %v278_v28, %v286_v31  ;;  %v944_v30 = vld [vmem:[%s1199_s11 + $0x8] sm:$0xff]   ;;  %v945_v31 = vld [vmem:[%s1199_s11] sm:$0xff]   ;;  %s999_s11 = smov [#allocation5]  }
 0x3a9   :  { %v865_v33 = vpop.f32.mrf.mxu1  ;;  %s775_s23 = sshll.u32 %s999_s11, 4  ;;  %s776_s23 = int_to_ptr.vmem [resolvable:$true] %s775_s23 }
 0x3aa   :  { %vm285_vm8 = vcmp.ge.f32.partialorder %v281_v32, 0.0  ;;  %v287_v34 = vmul.f32 0.01, %v281_v32  ;;  %p971_p6 = scmp.lt.s32.totalorder %s776_s23, %s776_s23 }
 0x3ac   :  { %v289_v36 = vsel %vm285_vm8, %v281_v32, %v287_v34  ;;  %v805_v32 = vld [vmem:[%s1198_s10] ss:$0 sm:$0xff]  ;;  %s966_s10 = scalar_lea.vmem %s776_s23, 32 }
 0x3ad   :  { %v290_v37 = vpack.c.bf16 %v289_v36, %v288_v35  ;;  %p967_p5 = scmp.ne.s32.totalorder %s776_s23, %s966_s10  ;;  %p972_p7 = scmp.lt.s32.totalorder %s966_s10, %s966_s10 }
 0x3af   :  { %867 = vmatpush3.bf16.msra.mxu0 %v290_v37  ;;  %p973_p8 = por %p972_p7, %p971_p6 }
 0x3b0   :  { %878 = vmatprep.subr.bf16.mxu0 %v991_v0 }
 0x3b1   :  { %p974_p9 = pnand %p973_p8, %p967_p5 }
 0x3b2   :  { %869 = vmatmul.mubr.msk.bf16.vlgmr.msra.gmra.mxu0 %vm73_vm1, %v1085_v2 }
 0x3b3   :  { %880 = vmatprep.mubr.msk.bf16.mxu0 %vm992_vm0, %v991_v0 }
 0x472   :  { %v325_v38 = vpop.f32.mrf.mxu0 }
 0x474   :  { %v870_v39 = vpop.f32.mrf.mxu0 }
 0x476   :  { %v328_v40 = vpop.f32.mrf.mxu0 }
 0x477   :  { %v332_v41 = vpack.c.bf16 %v328_v40, %v325_v38 }
 0x478   :  { %v871_v42 = vpop.f32.mrf.mxu0 }
 0x479   :  { %418 = vrot.lane.b32.xlu1 %v332_v41, %s996_s3  ;;  %873 = vmatpush3.bf16.msra.mxu1 %v332_v41 }
 0x47a   :  { %884 = vmatprep.subr.bf16.mxu1 %v991_v0 }
 0x47c   :  { %875 = vmatmul.mubr.msk.bf16.vlgmr.msra.gmra.mxu1 %vm73_vm1, %v1085_v2 }
 0x47d   :  { %892 = vmatprep.mubr.msk.bf16.mxu1 %vm992_vm0, %v991_v0  ;;  %885 = vmatpush3.bf16.msra.mxu1 %v937_v48 }
 0x47e   :  { %886 = vmatprep.subr.bf16.mxu1 %v991_v0 }
 0x481   :  { %887 = vmatpush3.bf16.msra.mxu1 %v938_v49 }
 0x482   :  { %888 = vmatprep.subr.bf16.mxu1 %v991_v0 }
 0x485   :  { %889 = vmatpush3.bf16.msra.mxu1 %v939_v50 }
 0x486   :  { %890 = vmatprep.subr.bf16.mxu1 %v991_v0 }
 0x489   :  { %891 = vmatpush3.bf16.msra.mxu1 %v940_v51 }
 0x48a   :  { %908 = vmatprep.subr.bf16.mxu1 %v991_v0 }
 0x4eb   :  { %v419_v57 = vpop.permute.xlu1 %418 }
 0x4ec   :  { %v428_v59 = vsel %vm73_vm1, %v290_v37, %v419_v57 }
 0x53c   :  { %v367_v43 = vpop.f32.mrf.mxu1 }
 0x53e   :  { %v876_v44 = vpop.f32.mrf.mxu1 }
 0x540   :  { %v370_v45 = vpop.f32.mrf.mxu1 }
 0x541   :  { %v374_v46 = vpack.c.bf16 %v370_v45, %v367_v43 }
 0x542   :  { %v877_v47 = vpop.f32.mrf.mxu1 }
 0x543   :  { %421 = vrot.lane.b32.xlu0 %v374_v46, %s997_s20  ;;  %879 = vmatpush3.bf16.msra.mxu0 %v374_v46 }
 0x544   :  { %896 = vmatprep.subr.bf16.mxu0 %v991_v0 }
 0x546   :  { %881 = vmatmul.mubr.msk.bf16.vlgmr.msra.gmra.mxu0 %vm73_vm1, %v1085_v2 }
 0x547   :  { %898 = vmatprep.mubr.msk.bf16.mxu0 %vm992_vm0, %v991_v0 }
 0x5b5   :  { %v422_v58 = vpop.permute.xlu0 %421 }
 0x5b6   :  { %v431_v60 = vsel %vm429_vm9, %v428_v59, %v422_v58 }
 0x606   :  { %v409_v52 = vpop.f32.mrf.mxu0 }
 0x608   :  { %v882_v53 = vpop.f32.mrf.mxu0 }
 0x60a   :  { %v412_v54 = vpop.f32.mrf.mxu0 }
 0x60b   :  { %v416_v55 = vpack.c.bf16 %v412_v54, %v409_v52 }
 0x60c   :  { %v883_v56 = vpop.f32.mrf.mxu0 }
 0x60d   :  { %424 = vrot.lane.b32.xlu1 %v416_v55, %s998_s29 }
 0x67f   :  { %v425_v61 = vpop.permute.xlu1 %424 }
 0x680   :  { %v434_v62 = vsel %vm432_vm10, %v431_v60, %v425_v61 }
 0x681   :  { %893 = vmatmul.mubr.msk.bf16.vlgmr.msra.gmra.mxu1 %vm474_vm11, %v434_v62 }
 0x682   :  { %912 = vmatprep.mubr.msk.bf16.mxu1 %vm992_vm0, %v991_v0  ;;  %909 = vmatpush3.bf16.msra.mxu1 %v942_v19 }
 0x683   :  { %910 = vmatprep.subr.bf16.mxu1 %v991_v0 }
 0x686   :  { %911 = vmatpush3.bf16.msra.mxu1 %v943_v20 }
 0x741   :  { %v511_v1 = vpop.f32.mrf.mxu1 }
 0x742   :  { %v512_v2 = vadd.f32 %v795_v63, %v511_v1 }
 0x743   :  { %v894_v3 = vpop.f32.mrf.mxu1 }
 0x744   :  { %v520_v5 = vmul.f32 0.01, %v512_v2  ;;  %vm518_vm12 = vcmp.ge.f32.partialorder %v512_v2, 0.0 }
 0x745   :  { %v514_v4 = vpop.f32.mrf.mxu1 }
 0x746   :  { %v515_v6 = vadd.f32 %v795_v63, %v514_v4  ;;  %v522_v9 = vsel %vm518_vm12, %v512_v2, %v520_v5 }
 0x747   :  { %v895_v7 = vpop.f32.mrf.mxu1 }
 0x748   :  { %vm519_vm13 = vcmp.ge.f32.partialorder %v515_v6, 0.0  ;;  %v521_v8 = vmul.f32 0.01, %v515_v6 }
 0x74a   :  { %v523_v10 = vsel %vm519_vm13, %v515_v6, %v521_v8 }
 0x74b   :  { %v524_v11 = vpack.c.bf16 %v523_v10, %v522_v9 }
 0x74d   :  { %897 = vmatpush3.bf16.msra.mxu0 %v524_v11 }
 0x74e   :  { %902 = vmatprep.subr.bf16.mxu0 %v991_v0 }
 0x750   :  { %899 = vmatmul.mubr.msk.bf16.vlgmr.msra.gmra.mxu0 %vm73_vm1, %v525_v12 }
 0x751   :  { %904 = vmatprep.mubr.msk.bf16.mxu0 %vm992_vm0, %v991_v0  ;;  %903 = vmatpush3.bf16.msra.mxu0 %v941_v13 }
 0x752   :  { %916 = vmatprep.subr.bf16.mxu0 %v991_v0 }
 0x810   :  { %v563_v14 = vpop.f32.mrf.mxu0 }
 0x811   :  { %v569_v15 = vpack.c.bf16 %v563_v14, %v563_v14 }
 0x812   :  { %v900_v16 = vpop.f32.mrf.mxu0 }
 0x813   :  { %905 = vmatmul.mubr.msk.bf16.vlgmr.msra.gmra.mxu0 %vm73_vm1, %v569_v15 }
 0x814   :  { %v566_v17 = vpop.f32.mrf.mxu0  ;;  %920 = vmatprep.mubr.msk.bf16.mxu0 %vm992_vm0, %v991_v0  ;;  %917 = vmatpush3.bf16.msra.mxu0 %v944_v30 }
 0x815   :  { %918 = vmatprep.subr.bf16.mxu0 %v991_v0  ;;  %v809_v0 = vld [vmem:[%s1200_s12] ss:$0 sm:$0xff] }
 0x816   :  { %v901_v18 = vpop.f32.mrf.mxu0 }
 0x818   :  { %919 = vmatpush3.bf16.msra.mxu0 %v945_v31 }
 0x8d3   :  { %v622_v22 = vpop.f32.mrf.mxu0 }
 0x8d4   :  { %v623_v23 = vadd.f32 %v802_v21, %v622_v22 }
 0x8d5   :  { %v906_v24 = vpop.f32.mrf.mxu0 }
 0x8d6   :  { %vm628_vm14 = vcmp.ge.f32.partialorder %v623_v23, 0.0  ;;  %v629_v25 = vmul.f32 0.01, %v623_v23 }
 0x8d7   :  { %v625_v26 = vpop.f32.mrf.mxu0 }
 0x8d8   :  { %v630_v27 = vsel %vm628_vm14, %v623_v23, %v629_v25 }
 0x8d9   :  { %v631_v28 = vpack.c.bf16 %v630_v27, %v630_v27  ;;  %v907_v29 = vpop.f32.mrf.mxu0 }
 0x8db   :  { %913 = vmatmul.mubr.msk.bf16.vlgmr.msra.gmra.mxu1 %vm429_vm9, %v631_v28 }
 0x99b   :  { %v692_v33 = vpop.f32.mrf.mxu1 }
 0x99c   :  { %v693_v34 = vadd.f32 %v805_v32, %v692_v33 }
 0x99d   :  { %v914_v35 = vpop.f32.mrf.mxu1 }
 0x99e   :  { %vm698_vm15 = vcmp.ge.f32.partialorder %v693_v34, 0.0  ;;  %v699_v36 = vmul.f32 0.01, %v693_v34 }
 0x99f   :  { %v695_v37 = vpop.f32.mrf.mxu1 }
 0x9a0   :  { %v700_v38 = vsel %vm698_vm15, %v693_v34, %v699_v36 }
 0x9a1   :  { %v701_v39 = vpack.c.bf16 %v700_v38, %v700_v38  ;;  %v915_v40 = vpop.f32.mrf.mxu1 }
 0x9a3   :  { %921 = vmatmul.mubr.msk.bf16.vlgmr.msra.gmra.mxu0 %vm429_vm9, %v701_v39 }
 0xa63   :  { %v762_v41 = vpop.f32.mrf.mxu0 }
 0xa64   :  { %v763_v42 = vadd.f32 %v809_v0, %v762_v41 }
 0xa65   :  { %v922_v43 = vpop.f32.mrf.mxu0 }
 0xa66   :  { %768 = vst [vmem:[#allocation5] sm:$0x3] %v763_v42 }
 0xa67   :  { %v765_v44 = vpop.f32.mrf.mxu0 }
 0xa68   :  { %977 = shalt.err (!%p974_p9)
}
 0xa69   :  { %778 = dma.vmem_to_hbm [thread:$0]  %s776_s23, 32, %s1201_s13, [#allocation4]   ;;  %v923_v45 = vpop.f32.mrf.mxu0 }
 0xa6a   :  { %988 = dma.done.wait [#allocation4], 32  }
 0xa6b   :  { %989 = vsyncadd [#allocation4], 4294967264 }
 0xa6c   :  { %782 = vsyncpa [#allocation3], 1 }
 0xa6d   :  { %783 = vsyncpa [#allocation4], 1 }

</bundles_post_ra>
